<compile_context>
chip_gen: v5e
topology: v5e:2x2
jax: 0.10.0
libtpu: 0.0.40
codegen_flags: <defaults>
</compile_context>

<pallas_src>
import functools

import jax
import jax.numpy as jnp
from jax.experimental import pallas as pl
from jax.experimental.pallas import tpu as pltpu


# ----------------------------------------------------------------------------
# Hyper-parameters (mirrors a small `args` config of the PyTorch Controller)
# ----------------------------------------------------------------------------
CONTROLLER_HID = 32          # args.controller_hid
NUM_BLOCKS = 4               # args.num_blocks
SHARED_RNN_ACTIVATIONS = ("tanh", "ReLU", "identity", "sigmoid")
SOFTMAX_TEMPERATURE = 5.0    # args.softmax_temperature
TANH_C = 2.5                 # args.tanh_c
MODE = "train"               # args.mode
BATCH = 8                    # multiple of 8 -> fills vreg sublanes

# num_tokens for network_type == 'rnn'
NUM_TOKENS = [len(SHARED_RNN_ACTIVATIONS)]
for _idx in range(NUM_BLOCKS):
    NUM_TOKENS += [_idx + 1, len(SHARED_RNN_ACTIVATIONS)]
NUM_TOTAL_TOKENS = sum(NUM_TOKENS)

HID_PAD = 128                # per-gate lane padding of the hidden dim
LANE = 128                   # lane-dense decoder/logits width
SUBLANE = 8


def _round_up(x, m):
    return ((x + m - 1) // m) * m


# ----------------------------------------------------------------------------
# Fused rollout kernel: single invocation, statically unrolled step loop.
# Per step: gates = gates_x[s] + h @ W_h  ->  LSTM update  ->  decoder head.
# h/c are plain loop-carried values; written to the output refs once at end.
# ----------------------------------------------------------------------------
def _controller_rollout_kernel(gx_ref, h0_ref, c0_ref, wh_ref,
                               wdec_ref, bdec_ref,
                               logits_ref, hx_out_ref, cx_out_ref,
                               *, num_steps, hp, temperature, tanh_c,
                               train_mode):
    h = h0_ref[...]                       # (Bp, Hp)
    c = c0_ref[...]                       # (Bp, Hp)
    w_h = wh_ref[...]                     # (Hp, 4*Hp)
    inv_temp = 1.0 / temperature

    for s in range(num_steps):            # static unroll (num_steps is small)
        # x-half of the gates was hoisted to one batched XLA matmul; here we
        # only add the recurrent half (K = 128, one MXU pass on every chip).
        gates = gx_ref[s] + jnp.dot(h, w_h,
                                    preferred_element_type=jnp.float32)

        # PyTorch LSTMCell gate order: input, forget, cell(g), output.
        # Each gate sits in its own aligned 128-lane chunk (no masked selects).
        i_g = jax.nn.sigmoid(gates[:, 0 * hp:1 * hp])
        f_g = jax.nn.sigmoid(gates[:, 1 * hp:2 * hp])
        g_g = jnp.tanh(gates[:, 2 * hp:3 * hp])
        o_g = jax.nn.sigmoid(gates[:, 3 * hp:4 * hp])

        c = f_g * c + i_g * g_g
        h = o_g * jnp.tanh(c)

        # decoder head for this step (static slice of the resident slab).
        logits = jnp.dot(h, wdec_ref[s],
                         preferred_element_type=jnp.float32) + bdec_ref[s]
        logits = logits * inv_temp
        if train_mode:
            logits = tanh_c * jnp.tanh(logits)
        logits_ref[s] = logits             # lane-dense unmasked store

    hx_out_ref[...] = h
    cx_out_ref[...] = c


def _rollout_call(gates_x, h0, c0, w_h, w_dec, b_dec,
                  *, temperature, tanh_c, train_mode):
    """One gridless pallas_call; every operand fully VMEM-resident."""
    num_steps, b_pad, four_hp = gates_x.shape
    hp = four_hp // 4

    kernel = functools.partial(
        _controller_rollout_kernel, num_steps=num_steps, hp=hp,
        temperature=temperature, tanh_c=tanh_c, train_mode=train_mode)

    vmem_spec = functools.partial(pl.BlockSpec,
                                  memory_space=pltpu.MemorySpace.VMEM)

    logits, hx, cx = pl.pallas_call(
        kernel,
        in_specs=[vmem_spec()] * 6,
        out_specs=[vmem_spec(), vmem_spec(), vmem_spec()],
        out_shape=[
            jax.ShapeDtypeStruct((num_steps, b_pad, LANE), jnp.float32),
            jax.ShapeDtypeStruct((b_pad, hp), jnp.float32),
            jax.ShapeDtypeStruct((b_pad, hp), jnp.float32),
        ],
    )(gates_x, h0, c0, w_h, w_dec, b_dec)
    return logits, hx, cx


# ----------------------------------------------------------------------------
# Parameter construction (deterministic, mirrors reset_parameters()) +
# one-time packing into the fused / padded kernel layout.
# ----------------------------------------------------------------------------
def init_params(key, hid=CONTROLLER_HID, num_tokens=NUM_TOKENS):
    init_range = 0.1
    keys = jax.random.split(key, 5 + len(num_tokens))
    u = lambda k, shape: jax.random.uniform(k, shape, jnp.float32,
                                            -init_range, init_range)
    params = {
        "encoder": u(keys[0], (sum(num_tokens), hid)),       # Embedding table
        "w_ih": u(keys[1], (4 * hid, hid)),                   # LSTMCell weight_ih
        "w_hh": u(keys[2], (4 * hid, hid)),                   # LSTMCell weight_hh
        "b_ih": u(keys[3], (4 * hid,)),
        "b_hh": u(keys[4], (4 * hid,)),
        "decoders": [],
    }
    for i, size in enumerate(num_tokens):
        w = u(keys[5 + i], (size, hid))                       # Linear weight
        bzero = jnp.zeros((size,), jnp.float32)               # decoder.bias = 0
        params["decoders"].append((w, bzero))
    return params


def prepare_kernel_params(raw, hid=CONTROLLER_HID, hp=HID_PAD,
                          num_tokens=NUM_TOKENS):
    """Done ONCE: split/pack W_ih / W_hh, pre-sum biases, pad lane-dense."""
    w_ih, w_hh = raw["w_ih"], raw["w_hh"]            # (4H, H)
    b_sum = raw["b_ih"] + raw["b_hh"]                # (4H,)

    w_x = jnp.zeros((hp, 4 * hp), jnp.float32)       # x-half (used in XLA hoist)
    w_h = jnp.zeros((hp, 4 * hp), jnp.float32)       # recurrent half (in-kernel)
    b_cat = jnp.zeros((1, 4 * hp), jnp.float32)
    for g in range(4):
        w_x = w_x.at[0:hid, g * hp:g * hp + hid].set(
            w_ih[g * hid:(g + 1) * hid, :].T)
        w_h = w_h.at[0:hid, g * hp:g * hp + hid].set(
            w_hh[g * hid:(g + 1) * hid, :].T)
        b_cat = b_cat.at[0, g * hp:g * hp + hid].set(
            b_sum[g * hid:(g + 1) * hid])

    n_dec = len(num_tokens)
    w_dec_stack = jnp.zeros((n_dec, hp, LANE), jnp.float32)
    b_dec_stack = jnp.zeros((n_dec, 1, LANE), jnp.float32)
    for i, (w, b) in enumerate(raw["decoders"]):
        size = w.shape[0]
        w_dec_stack = w_dec_stack.at[i, 0:hid, 0:size].set(w.T)
        b_dec_stack = b_dec_stack.at[i, 0, 0:size].set(b)

    enc_pad = jnp.zeros((raw["encoder"].shape[0], hp), jnp.float32)
    enc_pad = enc_pad.at[:, 0:hid].set(raw["encoder"])

    return {"w_x": w_x, "w_h": w_h, "b_cat": b_cat,
            "w_dec_stack": w_dec_stack, "b_dec_stack": b_dec_stack,
            "encoder_pad": enc_pad, "hid": hid, "hp": hp}


def _pad_state(hx, cx, b_pad, hp):
    b, hid = hx.shape
    h0 = jnp.zeros((b_pad, hp), jnp.float32).at[:b, :hid].set(hx)
    c0 = jnp.zeros((b_pad, hp), jnp.float32).at[:b, :hid].set(cx)
    return h0, c0


# ----------------------------------------------------------------------------
# Public API
# ----------------------------------------------------------------------------
def controller_forward(kparams, inputs, hidden, block_idx, is_embed,
                       *, temperature=SOFTMAX_TEMPERATURE, tanh_c=TANH_C,
                       train_mode=(MODE == "train")):
    """Single step, mirrors Controller.forward(inputs, hidden, block_idx, is_embed)."""
    hx, cx = hidden
    b, hid = hx.shape
    hp = kparams["hp"]
    b_pad = _round_up(b, SUBLANE)

    if is_embed:
        embed = jnp.zeros((b, hp), jnp.float32).at[:, :inputs.shape[1]].set(
            inputs.astype(jnp.float32))
    else:
        embed = jnp.take(kparams["encoder_pad"], inputs, axis=0)   # (B, Hp)

    embeds = jnp.zeros((b_pad, hp), jnp.float32).at[:b, :].set(embed)
    # hoisted x-half of the gate matmul (one XLA matmul)
    gates_x = (embeds @ kparams["w_x"] + kparams["b_cat"]
               ).reshape(1, b_pad, 4 * hp)
    h0, c0 = _pad_state(hx, cx, b_pad, hp)

    logits_p, hx_p, cx_p = _rollout_call(
        gates_x, h0, c0, kparams["w_h"],
        kparams["w_dec_stack"][block_idx:block_idx + 1],
        kparams["b_dec_stack"][block_idx:block_idx + 1],
        temperature=temperature, tanh_c=tanh_c, train_mode=train_mode)

    size = NUM_TOKENS[block_idx]
    logits = logits_p[0, :b, :size]
    return logits, (hx_p[:b, :hid], cx_p[:b, :hid])


def controller_rollout(kparams, token_ids, hidden0, num_steps,
                       *, temperature=SOFTMAX_TEMPERATURE, tanh_c=TANH_C,
                       train_mode=(MODE == "train")):
    """Fused rollout over the Controller.sample() step schedule in ONE launch.

    Step 0 uses the static zero input (is_embed=True); step s>=1 embeds
    token_ids[s-1]; decoder for step s is decoders[s] (teacher-forced ids).
    Returns (logits_padded (num_steps, B_pad, 128), (hx, cx)).
    """
    hx0, cx0 = hidden0
    b, hid = hx0.shape
    hp = kparams["hp"]
    b_pad = _round_up(b, SUBLANE)

    emb = jnp.take(kparams["encoder_pad"], token_ids.reshape(-1), axis=0)
    emb = emb.reshape(num_steps - 1, b, hp)
    embeds = jnp.zeros((num_steps, b_pad, hp), jnp.float32)
    embeds = embeds.at[1:, :b, :].set(emb)

    # One batched XLA matmul for the x-half of all steps' gates.
    gates_x = (embeds.reshape(num_steps * b_pad, hp) @ kparams["w_x"]
               ).reshape(num_steps, b_pad, 4 * hp) + kparams["b_cat"]
    h0, c0 = _pad_state(hx0, cx0, b_pad, hp)

    logits_p, hx_p, cx_p = _rollout_call(
        gates_x, h0, c0, kparams["w_h"],
        kparams["w_dec_stack"][:num_steps], kparams["b_dec_stack"][:num_steps],
        temperature=temperature, tanh_c=tanh_c, train_mode=train_mode)

    return logits_p, (hx_p[:b, :hid], cx_p[:b, :hid])


# ----------------------------------------------------------------------------
# Pure-JAX reference (mirrors the PyTorch forward) for correctness checking
# ----------------------------------------------------------------------------
def _reference_forward(params, inputs, hidden, block_idx, is_embed):
    embed = inputs if is_embed else jnp.take(params["encoder"], inputs, axis=0)
    hx, cx = hidden
    hid = hx.shape[1]
    gates = (embed @ params["w_ih"].T + params["b_ih"]
             + hx @ params["w_hh"].T + params["b_hh"])
    i_g = jax.nn.sigmoid(gates[:, 0 * hid:1 * hid])
    f_g = jax.nn.sigmoid(gates[:, 1 * hid:2 * hid])
    g_g = jnp.tanh(gates[:, 2 * hid:3 * hid])
    o_g = jax.nn.sigmoid(gates[:, 3 * hid:4 * hid])
    c_new = f_g * cx + i_g * g_g
    h_new = o_g * jnp.tanh(c_new)
    w_dec, b_dec = params["decoders"][block_idx]
    logits = (h_new @ w_dec.T + b_dec) / SOFTMAX_TEMPERATURE
    if MODE == "train":
        logits = TANH_C * jnp.tanh(logits)
    return logits, (h_new, c_new)


# ----------------------------------------------------------------------------
if __name__ == "__main__":
    key = jax.random.PRNGKey(0)
    raw_params = init_params(key)
    kparams = prepare_kernel_params(raw_params)     # one-time weight packing

    B, hid = BATCH, CONTROLLER_HID
    inputs0 = jnp.zeros((B, hid), jnp.float32)                       # static_inputs
    hidden0 = (jnp.zeros((B, hid), jnp.float32),
               jnp.zeros((B, hid), jnp.float32))                     # init_hidden

    # --- single-step forward (matches Controller.forward) ------------------
    logits0, hidden1 = controller_forward(kparams, inputs0, hidden0,
                                          block_idx=0, is_embed=True)
    tok_key = jax.random.fold_in(key, 123)
    token_ids1 = jax.random.randint(tok_key, (B,), 0, NUM_TOTAL_TOKENS,
                                    dtype=jnp.int32)
    logits1, hidden2 = controller_forward(kparams, token_ids1, hidden1,
                                          block_idx=1, is_embed=False)
    jax.block_until_ready(logits1)

    ref0, rh1 = _reference_forward(raw_params, inputs0, hidden0, 0, True)
    ref1, rh2 = _reference_forward(raw_params, token_ids1, rh1, 1, False)
    assert jnp.allclose(logits0, ref0, atol=1e-4), "block 0 logits mismatch"
    assert jnp.allclose(logits1, ref1, atol=1e-4), "block 1 logits mismatch"
    assert jnp.allclose(hidden2[0], rh2[0], atol=1e-4), "hx mismatch"
    assert jnp.allclose(hidden2[1], rh2[1], atol=1e-4), "cx mismatch"

    # --- fused rollout: all sample() steps in ONE gridless pallas_call -----
    num_steps = 2 * (NUM_BLOCKS - 1) + 1   # same loop count as Controller.sample
    roll_key = jax.random.fold_in(key, 456)
    token_ids = jax.random.randint(roll_key, (num_steps - 1, B),
                                   0, NUM_TOTAL_TOKENS, dtype=jnp.int32)
    logits_all, (hx_f, cx_f) = controller_rollout(kparams, token_ids, hidden0,
                                                  num_steps)
    jax.block_until_ready(logits_all)

    # sequential reference over the same teacher-forced token schedule
    state = hidden0
    inp, emb_flag = inputs0, True
    ref_logits = []
    for s in range(num_steps):
        lg, state = _reference_forward(raw_params, inp, state, s, emb_flag)
        ref_logits.append(lg)
        if s + 1 < num_steps:
            inp, emb_flag = token_ids[s], False

    for s in range(num_steps):
        size = NUM_TOKENS[s]
        assert jnp.allclose(logits_all[s, :B, :size], ref_logits[s],
                            atol=1e-4), f"rollout logits mismatch at step {s}"
    assert jnp.allclose(hx_f, state[0], atol=1e-4), "rollout hx mismatch"
    assert jnp.allclose(cx_f, state[1], atol=1e-4), "rollout cx mismatch"

    # TODO(synk): multiple independent rollouts could be stacked along the
    # batch axis (or exposed as a "parallel" leading grid axis / core_map) to
    # fill the 256-row MXU on v6e/v7x and use both v7x TensorCores.
    print("KERNEL_OK")
</pallas_src>

<mosaic_0001>
module attributes {stable_mosaic.version = 11 : i64} {
  func.func @_controller_rollout_kernel(%arg0: memref<1x8x512xf32, #tpu.memory_space<vmem>>, %arg1: memref<8x128xf32, #tpu.memory_space<vmem>>, %arg2: memref<8x128xf32, #tpu.memory_space<vmem>>, %arg3: memref<128x512xf32, #tpu.memory_space<vmem>>, %arg4: memref<1x128x128xf32, #tpu.memory_space<vmem>>, %arg5: memref<1x1x128xf32, #tpu.memory_space<vmem>>, %arg6: memref<1x8x128xf32, #tpu.memory_space<vmem>>, %arg7: memref<8x128xf32, #tpu.memory_space<vmem>>, %arg8: memref<8x128xf32, #tpu.memory_space<vmem>>) attributes {dimension_semantics = [], scalar_prefetch = 0 : i64, scratch_operands = 0 : i64, tpu.core_type = #tpu.core_type<tc>} {
    %c0 = arith.constant 0 : index
    %c0_0 = arith.constant 0 : index
    %0 = vector.load %arg1[%c0, %c0_0] : memref<8x128xf32, #tpu.memory_space<vmem>>, vector<8x128xf32>
    %c0_1 = arith.constant 0 : index
    %c0_2 = arith.constant 0 : index
    %1 = vector.load %arg2[%c0_1, %c0_2] : memref<8x128xf32, #tpu.memory_space<vmem>>, vector<8x128xf32>
    %c0_3 = arith.constant 0 : index
    %c0_4 = arith.constant 0 : index
    %2 = vector.load %arg3[%c0_3, %c0_4] : memref<128x512xf32, #tpu.memory_space<vmem>>, vector<128x512xf32>
    %c0_5 = arith.constant 0 : index
    %c0_6 = arith.constant 0 : index
    %c0_7 = arith.constant 0 : index
    %3 = vector.load %arg0[%c0_5, %c0_6, %c0_7] : memref<1x8x512xf32, #tpu.memory_space<vmem>>, vector<1x8x512xf32>
    %4 = vector.shape_cast %3 : vector<1x8x512xf32> to vector<8x512xf32>
    %cst = arith.constant dense<0.000000e+00> : vector<8x512xf32>
    %5 = tpu.matmul %0, %2, %cst {dimension_numbers = #tpu.dot_dimension_numbers<[1], [0], [0], [1], [0, 0, 1, 1], [], []>} : vector<8x128xf32>, vector<128x512xf32>, vector<8x512xf32> -> vector<8x512xf32>
    %6 = arith.addf %4, %5 : vector<8x512xf32>
    %7 = vector.extract_strided_slice %6 {offsets = [0, 0], sizes = [8, 128], strides = [1, 1]} : vector<8x512xf32> to vector<8x128xf32>
    %8 = arith.negf %7 : vector<8x128xf32>
    %9 = math.exp %8 : vector<8x128xf32>
    %cst_8 = arith.constant 1.000000e+00 : f32
    %10 = vector.broadcast %cst_8 : f32 to vector<8x128xf32>
    %11 = arith.addf %10, %9 : vector<8x128xf32>
    %12 = arith.divf %10, %11 : vector<8x128xf32>
    %13 = vector.extract_strided_slice %6 {offsets = [0, 128], sizes = [8, 128], strides = [1, 1]} : vector<8x512xf32> to vector<8x128xf32>
    %14 = arith.negf %13 : vector<8x128xf32>
    %15 = math.exp %14 : vector<8x128xf32>
    %cst_9 = arith.constant 1.000000e+00 : f32
    %16 = vector.broadcast %cst_9 : f32 to vector<8x128xf32>
    %17 = arith.addf %16, %15 : vector<8x128xf32>
    %18 = arith.divf %16, %17 : vector<8x128xf32>
    %19 = vector.extract_strided_slice %6 {offsets = [0, 256], sizes = [8, 128], strides = [1, 1]} : vector<8x512xf32> to vector<8x128xf32>
    %20 = math.tanh %19 : vector<8x128xf32>
    %21 = vector.extract_strided_slice %6 {offsets = [0, 384], sizes = [8, 128], strides = [1, 1]} : vector<8x512xf32> to vector<8x128xf32>
    %22 = arith.negf %21 : vector<8x128xf32>
    %23 = math.exp %22 : vector<8x128xf32>
    %cst_10 = arith.constant 1.000000e+00 : f32
    %24 = vector.broadcast %cst_10 : f32 to vector<8x128xf32>
    %25 = arith.addf %24, %23 : vector<8x128xf32>
    %26 = arith.divf %24, %25 : vector<8x128xf32>
    %27 = arith.mulf %18, %1 : vector<8x128xf32>
    %28 = arith.mulf %12, %20 : vector<8x128xf32>
    %29 = arith.addf %27, %28 : vector<8x128xf32>
    %30 = math.tanh %29 : vector<8x128xf32>
    %31 = arith.mulf %26, %30 : vector<8x128xf32>
    %c0_11 = arith.constant 0 : index
    %c0_12 = arith.constant 0 : index
    %c0_13 = arith.constant 0 : index
    %32 = vector.load %arg4[%c0_11, %c0_12, %c0_13] : memref<1x128x128xf32, #tpu.memory_space<vmem>>, vector<1x128x128xf32>
    %33 = vector.shape_cast %32 : vector<1x128x128xf32> to vector<128x128xf32>
    %cst_14 = arith.constant dense<0.000000e+00> : vector<8x128xf32>
    %34 = tpu.matmul %31, %33, %cst_14 {dimension_numbers = #tpu.dot_dimension_numbers<[1], [0], [0], [1], [0, 0, 1, 1], [], []>} : vector<8x128xf32>, vector<128x128xf32>, vector<8x128xf32> -> vector<8x128xf32>
    %c0_15 = arith.constant 0 : index
    %c0_16 = arith.constant 0 : index
    %c0_17 = arith.constant 0 : index
    %35 = vector.load %arg5[%c0_15, %c0_16, %c0_17] : memref<1x1x128xf32, #tpu.memory_space<vmem>>, vector<1x1x128xf32>
    %36 = vector.shape_cast %35 : vector<1x1x128xf32> to vector<1x128xf32>
    %37 = vector.broadcast %36 : vector<1x128xf32> to vector<8x128xf32>
    %38 = arith.addf %34, %37 : vector<8x128xf32>
    %cst_18 = arith.constant 2.000000e-01 : f32
    %39 = vector.broadcast %cst_18 : f32 to vector<8x128xf32>
    %40 = arith.mulf %38, %39 : vector<8x128xf32>
    %41 = math.tanh %40 : vector<8x128xf32>
    %cst_19 = arith.constant 2.500000e+00 : f32
    %42 = vector.broadcast %cst_19 : f32 to vector<8x128xf32>
    %43 = arith.mulf %42, %41 : vector<8x128xf32>
    %c0_20 = arith.constant 0 : index
    %c0_21 = arith.constant 0 : index
    %c0_22 = arith.constant 0 : index
    %44 = vector.load %arg6[%c0_20, %c0_21, %c0_22] : memref<1x8x128xf32, #tpu.memory_space<vmem>>, vector<1x8x128xf32>
    %45 = vector.shape_cast %44 : vector<1x8x128xf32> to vector<8x128xf32>
    %46 = vector.shape_cast %43 : vector<8x128xf32> to vector<1x8x128xf32>
    tpu.vector_store %arg6[%c0_20, %c0_21, %c0_22], %46 {strides = array<i32>} : memref<1x8x128xf32, #tpu.memory_space<vmem>>, vector<1x8x128xf32>,
    %c0_23 = arith.constant 0 : index
    %c0_24 = arith.constant 0 : index
    %47 = vector.load %arg7[%c0_23, %c0_24] : memref<8x128xf32, #tpu.memory_space<vmem>>, vector<8x128xf32>
    tpu.vector_store %arg7[%c0_23, %c0_24], %31 {strides = array<i32>} : memref<8x128xf32, #tpu.memory_space<vmem>>, vector<8x128xf32>,
    %c0_25 = arith.constant 0 : index
    %c0_26 = arith.constant 0 : index
    %48 = vector.load %arg8[%c0_25, %c0_26] : memref<8x128xf32, #tpu.memory_space<vmem>>, vector<8x128xf32>
    tpu.vector_store %arg8[%c0_25, %c0_26], %29 {strides = array<i32>} : memref<8x128xf32, #tpu.memory_space<vmem>>, vector<8x128xf32>,
    return
  }
}

</mosaic_0001>

<bundles_post_ra>
// kernel: tpu_custom_call.1
= control target key start
LH: loop header
LB: loop body
LE: loop exit
PB: predicated region body
PF: predicated region fallthrough
CT: control target
= control target key end

     0   :  { %14 = vsyncpa [#allocation3], 0  ;;  %s733_s0 = inlined_call_operand.hbm [shape: f32[1,8,512], index: 0, kind: input, shape index: {}]   ;;  %s734_s1 = inlined_call_operand.hbm [shape: f32[8,128], index: 1, kind: input, shape index: {}]   ;;  %s735_s2 = inlined_call_operand.hbm [shape: f32[8,128], index: 2, kind: input, shape index: {}]   ;;  %s736_s3 = inlined_call_operand.hbm [shape: f32[128,512], index: 3, kind: input, shape index: {}]   ;;  %s737_s4 = inlined_call_operand.hbm [shape: f32[1,128,128], index: 4, kind: input, shape index: {}]   ;;  %s738_s5 = inlined_call_operand.vmem [shape: f32[1,1,128], index: 5, kind: input, shape index: {}]   ;;  %s739_s6 = inlined_call_operand.hbm [shape: f32[1,8,128], index: 6, kind: output, shape index: {0}]   ;;  %s740_s7 = inlined_call_operand.hbm [shape: f32[8,128], index: 7, kind: output, shape index: {1}]   ;;  %s741_s8 = inlined_call_operand.hbm [shape: f32[8,128], index: 8, kind: output, shape index: {2}]  }
   0x1   :  { %15 = vsyncpa [#allocation6], 0 }
   0x2   :  { %16 = vsyncpa [#allocation9], 0 }
   0x3   :  { %17 = vsyncpa [#allocation4], 0  ;;  %s35_s29 = sshll.u32 %s734_s1, 4  ;;  %s36_s29 = int_to_ptr.hbm [resolvable:$true] %s35_s29 }
   0x4   :  { %18 = vsyncpa [#allocation13], 0  ;;  %s649_s30 = smov [#allocation5]   ;;  %s56_s12 = sshll.u32 %s736_s3, 4  ;;  %s57_s12 = int_to_ptr.hbm [resolvable:$true] %s56_s12 }
   0x5   :  { %s37_s9 = sshll.u32 %s649_s30, 4  ;;  %s650_s13 = smov [#allocation8]   ;;  %s38_s9 = int_to_ptr.vmem [resolvable:$true] %s37_s9 }
   0x6   :  { %40 = dma.hbm_to_vmem [thread:$0]  %s36_s29, 128, %s38_s9, [#allocation6]  }
   0x7   :  { %s58_s14 = sshll.u32 %s650_s13, 4  ;;  %s651_s15 = smov 512   ;;  %s59_s14 = int_to_ptr.vmem [resolvable:$true] %s58_s14 }
   0x8   :  { %s652_s16 = smov 32   ;;  %s24_s1 = sshll.u32 %s733_s0, 4  ;;  %s25_s1 = int_to_ptr.hbm [resolvable:$true] %s24_s1 }
   0x9   :  { %64 = dma.hbm_to_vmem [thread:$0]  %s57_s12, 8192, %s59_s14, [#allocation9], %s651_s15, %s651_s15, %s652_s16  }
   0xa   :  { %s653_s19 = smov [#allocation2]   ;;  %s46_s3 = sshll.u32 %s735_s2, 4  ;;  %s47_s3 = int_to_ptr.hbm [resolvable:$true] %s46_s3 }
   0xb   :  { %s26_s20 = sshll.u32 %s653_s19, 4  ;;  %s654_s23 = smov [#allocation7]   ;;  %s27_s20 = int_to_ptr.vmem [resolvable:$true] %s26_s20 }
   0xc   :  { %29 = dma.hbm_to_vmem [thread:$0]  %s25_s1, 512, %s27_s20, [#allocation3]  }
   0xd   :  { %s48_s24 = sshll.u32 %s654_s23, 4  ;;  %s69_s27 = sshll.u32 %s737_s4, 4  ;;  %s49_s24 = int_to_ptr.vmem [resolvable:$true] %s48_s24  ;;  %s70_s27 = int_to_ptr.hbm [resolvable:$true] %s69_s27 }
   0xe   :  { %51 = dma.hbm_to_vmem [thread:$0]  %s47_s3, 128, %s49_s24, [#allocation6]  }
   0xf   :  { %s655_s0 = smov [#allocation10]   ;;  %s656_s29 = smov 128  }
  0x10   :  { %s71_s28 = sshll.u32 %s655_s0, 4  ;;  %s657_s30 = smov 8   ;;  %s72_s28 = int_to_ptr.vmem [resolvable:$true] %s71_s28 }
  0x11   :  { %77 = dma.hbm_to_vmem [thread:$0]  %s70_s27, 2048, %s72_s28, [#allocation9], %s656_s29, %s656_s29, %s657_s30  }
  0x12   :  { %639 = dma.done.wait [#allocation3], 512  }
  0x13   :  { %640 = vsyncadd [#allocation3], 4294966784 }
  0x14   :  { %641 = dma.done.wait [#allocation6], 256  }
  0x15   :  { %642 = vsyncadd [#allocation6], 4294967040 }
  0x16   :  { %643 = dma.done.wait [#allocation9], 10240  }
  0x17   :  { %644 = vsyncadd [#allocation9], 4294957056  ;;  %v162_v0 = vld [vmem:[#allocation8 + $0x1e0] sm:$0xff]  ;;  %v163_v1 = vld [vmem:[#allocation8 + $0x1e8] sm:$0xff]  ;;  %s658_s2 = smov [#allocation12]   ;;  %s381_s11 = sshll.u32 %s740_s7, 4  ;;  %s382_s11 = int_to_ptr.hbm [resolvable:$true] %s381_s11 }
  0x18   :  { %v165_v2 = vld [vmem:[#allocation8 + $0x1f8] sm:$0xff]  ;;  %170 = vmatpush.msra.mxu0 %v162_v0  ;;  %190 = vmatpush.msra.mxu1 %v163_v1  ;;  %v158_v3 = vld [vmem:[#allocation8 + $0x1c0] sm:$0xff]  ;;  %v159_v4 = vld [vmem:[#allocation8 + $0x1c8] sm:$0xff]  ;;  %s379_s4 = sshll.u32 %s658_s2, 4  ;;  %s659_s12 = smov [#allocation14]   ;;  %s380_s4 = int_to_ptr.vmem [resolvable:$true] %s379_s4 }
  0x19   :  { %v161_v5 = vld [vmem:[#allocation8 + $0x1d8] sm:$0xff]  ;;  %230 = vmatpush.msra.mxu3 %v165_v2  ;;  %v154_v6 = vld [vmem:[#allocation8 + $0x1a0] sm:$0xff]  ;;  %v155_v7 = vld [vmem:[#allocation8 + $0x1a8] sm:$0xff]  ;;  %s390_s13 = sshll.u32 %s659_s12, 4  ;;  %s392_s16 = sshll.u32 %s741_s8, 4  ;;  %s391_s13 = int_to_ptr.vmem [resolvable:$true] %s390_s13  ;;  %s393_s16 = int_to_ptr.hbm [resolvable:$true] %s392_s16 }
  0x1a   :  { %171 = vmatpush.msra.mxu0 %v158_v3  ;;  %191 = vmatpush.msra.mxu1 %v159_v4  ;;  %v157_v8 = vld [vmem:[#allocation8 + $0x1b8] sm:$0xff]  ;;  %v150_v9 = vld [vmem:[#allocation8 + $0x180] sm:$0xff]  ;;  %v151_v10 = vld [vmem:[#allocation8 + $0x188] sm:$0xff]  ;;  %s660_s7 = smov [#allocation11]   ;;  %s370_s21 = sshll.u32 %s739_s6, 4  ;;  %s371_s21 = int_to_ptr.hbm [resolvable:$true] %s370_s21 }
  0x1b   :  { %231 = vmatpush.msra.mxu3 %v161_v5  ;;  %v153_v11 = vld [vmem:[#allocation8 + $0x198] sm:$0xff]  ;;  %v146_v12 = vld [vmem:[#allocation8 + $0x160] sm:$0xff]  ;;  %v147_v13 = vld [vmem:[#allocation8 + $0x168] sm:$0xff]  ;;  %s368_s1 = sshll.u32 %s660_s7, 4  ;;  %s369_s1 = int_to_ptr.vmem [resolvable:$true] %s368_s1 }
  0x1c   :  { %172 = vmatpush.msra.mxu0 %v154_v6  ;;  %192 = vmatpush.msra.mxu1 %v155_v7  ;;  %v149_v14 = vld [vmem:[#allocation8 + $0x178] sm:$0xff]  ;;  %v142_v15 = vld [vmem:[#allocation8 + $0x140] sm:$0xff]  ;;  %v143_v16 = vld [vmem:[#allocation8 + $0x148] sm:$0xff] }
  0x1d   :  { %232 = vmatpush.msra.mxu3 %v157_v8  ;;  %v164_v17 = vld [vmem:[#allocation8 + $0x1f0] sm:$0xff]  ;;  %v145_v18 = vld [vmem:[#allocation8 + $0x158] sm:$0xff]  ;;  %v138_v20 = vld [vmem:[#allocation8 + $0x120] sm:$0xff] }
  0x1e   :  { %173 = vmatpush.msra.mxu0 %v150_v9  ;;  %193 = vmatpush.msra.mxu1 %v151_v10  ;;  %v160_v19 = vld [vmem:[#allocation8 + $0x1d0] sm:$0xff]  ;;  %v139_v21 = vld [vmem:[#allocation8 + $0x128] sm:$0xff]  ;;  %v141_v22 = vld [vmem:[#allocation8 + $0x138] sm:$0xff] }
  0x1f   :  { %233 = vmatpush.msra.mxu3 %v153_v11  ;;  %210 = vmatpush.msra.mxu2 %v164_v17  ;;  %v156_v23 = vld [vmem:[#allocation8 + $0x1b0] sm:$0xff]  ;;  %v134_v24 = vld [vmem:[#allocation8 + $0x100] sm:$0xff]  ;;  %v135_v25 = vld [vmem:[#allocation8 + $0x108] sm:$0xff] }
  0x20   :  { %174 = vmatpush.msra.mxu0 %v146_v12  ;;  %194 = vmatpush.msra.mxu1 %v147_v13  ;;  %v137_v26 = vld [vmem:[#allocation8 + $0x118] sm:$0xff]  ;;  %v152_v27 = vld [vmem:[#allocation8 + $0x190] sm:$0xff]  ;;  %v130_v28 = vld [vmem:[#allocation8 + $0xe0] sm:$0xff] }
  0x21   :  { %234 = vmatpush.msra.mxu3 %v149_v14  ;;  %211 = vmatpush.msra.mxu2 %v160_v19  ;;  %v131_v29 = vld [vmem:[#allocation8 + $0xe8] sm:$0xff]  ;;  %v133_v30 = vld [vmem:[#allocation8 + $0xf8] sm:$0xff]  ;;  %v148_v31 = vld [vmem:[#allocation8 + $0x170] sm:$0xff] }
  0x22   :  { %175 = vmatpush.msra.mxu0 %v142_v15  ;;  %195 = vmatpush.msra.mxu1 %v143_v16  ;;  %v126_v32 = vld [vmem:[#allocation8 + $0xc0] sm:$0xff]  ;;  %v127_v33 = vld [vmem:[#allocation8 + $0xc8] sm:$0xff]  ;;  %v129_v34 = vld [vmem:[#allocation8 + $0xd8] sm:$0xff] }
  0x23   :  { %235 = vmatpush.msra.mxu3 %v145_v18  ;;  %212 = vmatpush.msra.mxu2 %v156_v23  ;;  %v144_v35 = vld [vmem:[#allocation8 + $0x150] sm:$0xff]  ;;  %v122_v36 = vld [vmem:[#allocation8 + $0xa0] sm:$0xff]  ;;  %v123_v37 = vld [vmem:[#allocation8 + $0xa8] sm:$0xff] }
  0x24   :  { %176 = vmatpush.msra.mxu0 %v138_v20  ;;  %196 = vmatpush.msra.mxu1 %v139_v21  ;;  %v125_v38 = vld [vmem:[#allocation8 + $0xb8] sm:$0xff]  ;;  %v140_v39 = vld [vmem:[#allocation8 + $0x130] sm:$0xff]  ;;  %v118_v40 = vld [vmem:[#allocation8 + $0x80] sm:$0xff] }
  0x25   :  { %236 = vmatpush.msra.mxu3 %v141_v22  ;;  %213 = vmatpush.msra.mxu2 %v152_v27  ;;  %v119_v41 = vld [vmem:[#allocation8 + $0x88] sm:$0xff]  ;;  %v121_v42 = vld [vmem:[#allocation8 + $0x98] sm:$0xff]  ;;  %v136_v43 = vld [vmem:[#allocation8 + $0x110] sm:$0xff] }
  0x26   :  { %177 = vmatpush.msra.mxu0 %v134_v24  ;;  %197 = vmatpush.msra.mxu1 %v135_v25  ;;  %v114_v44 = vld [vmem:[#allocation8 + $0x60] sm:$0xff]  ;;  %v115_v45 = vld [vmem:[#allocation8 + $0x68] sm:$0xff]  ;;  %v117_v46 = vld [vmem:[#allocation8 + $0x78] sm:$0xff] }
  0x27   :  { %237 = vmatpush.msra.mxu3 %v137_v26  ;;  %214 = vmatpush.msra.mxu2 %v148_v31  ;;  %v132_v47 = vld [vmem:[#allocation8 + $0xf0] sm:$0xff]  ;;  %v110_v48 = vld [vmem:[#allocation8 + $0x40] sm:$0xff]  ;;  %v111_v49 = vld [vmem:[#allocation8 + $0x48] sm:$0xff] }
  0x28   :  { %178 = vmatpush.msra.mxu0 %v130_v28  ;;  %198 = vmatpush.msra.mxu1 %v131_v29  ;;  %v113_v50 = vld [vmem:[#allocation8 + $0x58] sm:$0xff]  ;;  %v128_v51 = vld [vmem:[#allocation8 + $0xd0] sm:$0xff]  ;;  %v106_v52 = vld [vmem:[#allocation8 + $0x20] sm:$0xff] }
  0x29   :  { %238 = vmatpush.msra.mxu3 %v133_v30  ;;  %215 = vmatpush.msra.mxu2 %v144_v35  ;;  %v107_v53 = vld [vmem:[#allocation8 + $0x28] sm:$0xff]  ;;  %v109_v54 = vld [vmem:[#allocation8 + $0x38] sm:$0xff]  ;;  %v124_v55 = vld [vmem:[#allocation8 + $0xb0] sm:$0xff] }
  0x2a   :  { %179 = vmatpush.msra.mxu0 %v126_v32  ;;  %199 = vmatpush.msra.mxu1 %v127_v33  ;;  %v102_v56 = vld [vmem:[#allocation8] sm:$0xff]  ;;  %v103_v57 = vld [vmem:[#allocation8 + $0x8] sm:$0xff]  ;;  %v105_v58 = vld [vmem:[#allocation8 + $0x18] sm:$0xff] }
  0x2b   :  { %239 = vmatpush.msra.mxu3 %v129_v34  ;;  %216 = vmatpush.msra.mxu2 %v140_v39  ;;  %v100_v59 = vld [vmem:[#allocation5] sm:$0xff]  ;;  %v332_v1 = vld [vmem:[#allocation10 + $0x78] sm:$0xff]  ;;  %v330_v3 = vld [vmem:[#allocation10 + $0x68] sm:$0xff] }
  0x2c   :  { %180 = vmatpush.msra.mxu0 %v122_v36  ;;  %200 = vmatpush.msra.mxu1 %v123_v37  ;;  %v120_v60 = vld [vmem:[#allocation8 + $0x90] sm:$0xff]  ;;  %v329_v4 = vld [vmem:[#allocation10 + $0x60] sm:$0xff]  ;;  %v328_v5 = vld [vmem:[#allocation10 + $0x58] sm:$0xff] }
  0x2d   :  { %240 = vmatpush.msra.mxu3 %v125_v38  ;;  %217 = vmatpush.msra.mxu2 %v136_v43  ;;  %v116_v61 = vld [vmem:[#allocation8 + $0x70] sm:$0xff]  ;;  %v326_v7 = vld [vmem:[#allocation10 + $0x48] sm:$0xff]  ;;  %v325_v8 = vld [vmem:[#allocation10 + $0x40] sm:$0xff] }
  0x2e   :  { %181 = vmatpush.msra.mxu0 %v118_v40  ;;  %201 = vmatpush.msra.mxu1 %v119_v41  ;;  %v112_v62 = vld [vmem:[#allocation8 + $0x50] sm:$0xff]  ;;  %v324_v9 = vld [vmem:[#allocation10 + $0x38] sm:$0xff]  ;;  %v322_v16 = vld [vmem:[#allocation10 + $0x28] sm:$0xff] }
  0x2f   :  { %241 = vmatpush.msra.mxu3 %v121_v42  ;;  %218 = vmatpush.msra.mxu2 %v132_v47  ;;  %v108_v63 = vld [vmem:[#allocation8 + $0x30] sm:$0xff]  ;;  %v167_v11 = vld [vmem:[#allocation2 + $0x8] sm:$0xff]  ;;  %v321_v19 = vld [vmem:[#allocation10 + $0x20] sm:$0xff] }
  0x30   :  { %182 = vmatpush.msra.mxu0 %v114_v44  ;;  %202 = vmatpush.msra.mxu1 %v115_v45  ;;  %v104_v0 = vld [vmem:[#allocation8 + $0x10] sm:$0xff]  ;;  %v320_v21 = vld [vmem:[#allocation10 + $0x18] sm:$0xff]  ;;  %v169_v22 = vld [vmem:[#allocation2 + $0x18] sm:$0xff] }
  0x31   :  { %242 = vmatpush.msra.mxu3 %v117_v46  ;;  %219 = vmatpush.msra.mxu2 %v128_v51  ;;  %v331_v2 = vld [vmem:[#allocation10 + $0x70] sm:$0xff]  ;;  %v318_v25 = vld [vmem:[#allocation10 + $0x8] sm:$0xff]  ;;  %v317_v27 = vld [vmem:[#allocation10] sm:$0xff] }
  0x32   :  { %183 = vmatpush.msra.mxu0 %v110_v48  ;;  %203 = vmatpush.msra.mxu1 %v111_v49  ;;  %v327_v6 = vld [vmem:[#allocation10 + $0x50] sm:$0xff]  ;;  %v168_v33 = vld [vmem:[#allocation2 + $0x10] sm:$0xff] }
  0x33   :  { %243 = vmatpush.msra.mxu3 %v113_v50  ;;  %220 = vmatpush.msra.mxu2 %v124_v55  ;;  %v166_v10 = vld [vmem:[#allocation2] sm:$0xff] }
  0x34   :  { %184 = vmatpush.msra.mxu0 %v106_v52  ;;  %204 = vmatpush.msra.mxu1 %v107_v53  ;;  %v323_v12 = vld [vmem:[#allocation10 + $0x30] sm:$0xff] }
  0x35   :  { %244 = vmatpush.msra.mxu3 %v109_v54  ;;  %221 = vmatpush.msra.mxu2 %v120_v60  ;;  %v319_v23 = vld [vmem:[#allocation10 + $0x10] sm:$0xff] }
  0x36   :  { %185 = vmatpush.msra.mxu0 %v102_v56  ;;  %205 = vmatpush.msra.mxu1 %v103_v57  ;;  %v101_v57 = vld [vmem:[#allocation7] sm:$0xff] }
  0x37   :  { %245 = vmatpush.msra.mxu3 %v105_v58  ;;  %186 = vmatmul.f32.vlgmr.msra.gmra.mxu0 %v100_v59 }
  0x38   :  { %206 = vmatmul.f32.vlgmr.msra.gmra.mxu1 %v100_v59  ;;  %246 = vmatmul.f32.vlgmr.msra.gmra.mxu3 %v100_v59 }
  0x39   :  { %222 = vmatpush.msra.mxu2 %v116_v61  ;;  %337 = vmatpush.msrb.mxu0 %v332_v1 }
  0x3b   :  { %223 = vmatpush.msra.mxu2 %v112_v62  ;;  %338 = vmatpush.msrb.mxu0 %v331_v2 }
  0x3d   :  { %224 = vmatpush.msra.mxu2 %v108_v63  ;;  %339 = vmatpush.msrb.mxu0 %v330_v3 }
  0x3f   :  { %225 = vmatpush.msra.mxu2 %v104_v0  ;;  %340 = vmatpush.msrb.mxu0 %v329_v4 }
  0x40   :  { %226 = vmatmul.f32.vlgmr.msra.gmra.mxu2 %v100_v59 }
  0x41   :  { %341 = vmatpush.msrb.mxu0 %v328_v5 }
  0x43   :  { %342 = vmatpush.msrb.mxu0 %v327_v6 }
  0x45   :  { %343 = vmatpush.msrb.mxu0 %v326_v7 }
  0x47   :  { %344 = vmatpush.msrb.mxu0 %v325_v8 }
  0x49   :  { %345 = vmatpush.msrb.mxu0 %v324_v9 }
  0x4b   :  { %346 = vmatpush.msrb.mxu0 %v323_v12 }
  0x4d   :  { %347 = vmatpush.msrb.mxu0 %v322_v16 }
  0x4f   :  { %348 = vmatpush.msrb.mxu0 %v321_v19 }
  0x51   :  { %349 = vmatpush.msrb.mxu0 %v320_v21 }
  0x53   :  { %350 = vmatpush.msrb.mxu0 %v319_v23 }
  0x55   :  { %351 = vmatpush.msrb.mxu0 %v318_v25 }
  0x57   :  { %352 = vmatpush.msrb.mxu0 %v317_v27 }
  0xb4   :  { %v187_v13 = vpop.f32.mrf.mxu0 }
  0xb5   :  { %v250_v14 = vadd.f32 %v187_v13, %v166_v10  ;;  %v207_v15 = vpop.f32.mrf.mxu1 }
  0xb6   :  { %v251_v17 = vadd.f32 %v207_v15, %v167_v11  ;;  %v428_v11 = vld [vmem:[%s738_s5] ss:$0 sm:$0xff] }
  0xb7   :  { %v413_v18 = vmul.f32 -1.442695, %v250_v14 }
  0xb8   :  { %v414_v20 = vmul.f32 -1.442695, %v251_v17 }
  0xb9   :  { %429 = vpow2.f32 %v413_v18 }
  0xba   :  { %431 = vpow2.f32 %v414_v20 }
  0xbb   :  { %v247_v24 = vpop.f32.mrf.mxu3 }
  0xbc   :  { %v253_v26 = vadd.f32 %v247_v24, %v169_v22 }
  0xbe   :  { %v415_v28 = vmul.f32 -1.442695, %v253_v26 }
  0xbf   :  { %v430_v29 = vpop.eup %429 }
  0xc0   :  { %v432_v30 = vpop.eup %431  ;;  %v257_v31 = vadd.f32 1.0, %v430_v29  ;;  %433 = vpow2.f32 %v415_v28 }
  0xc1   :  { %v276_v32 = vadd.f32 1.0, %v432_v30 }
  0xc2   :  { %435 = vrcp.f32 %v257_v31  ;;  %v269_v44 = vand.u32 2147483648, %v257_v31  ;;  %v267_v47 = vand.u32 2147483647, %v257_v31  ;;  %vm263_vm2 = vweird.f32 %v257_v31 }
  0xc3   :  { %437 = vrcp.f32 %v276_v32  ;;  %v227_v34 = vpop.f32.mrf.mxu2  ;;  %v288_v45 = vand.u32 2147483648, %v276_v32  ;;  %v286_v49 = vand.u32 2147483647, %v276_v32  ;;  %vm282_vm3 = vweird.f32 %v276_v32 }
  0xc4   :  { %v252_v36 = vadd.f32 %v227_v34, %v168_v33  ;;  %v270_v54 = vor.u32 1.1754944e-38, %v269_v44  ;;  %vm268_vm6 = vcmp.eq.f32.partialorder %v267_v47, 8.507059e+37 }
  0xc5   :  { %v289_v56 = vor.u32 1.1754944e-38, %v288_v45  ;;  %vm287_vm7 = vcmp.eq.f32.partialorder %v286_v49, 8.507059e+37 }
  0xc6   :  { %v434_v35 = vpop.eup %433 }
  0xc7   :  { %v296_v37 = vadd.f32 1.0, %v434_v35 }
  0xc8   :  { %v436_v38 = vpop.eup %435 }
  0xc9   :  { %v438_v39 = vpop.eup %437  ;;  %v259_v40 = vmul.f32 %v436_v38, %v257_v31  ;;  %439 = vrcp.f32 %v296_v37  ;;  %vm264_vm0 = vweird.f32 %v436_v38  ;;  %v308_v4 = vand.u32 2147483648, %v296_v37 }
  0xca   :  { %v278_v41 = vmul.f32 %v438_v39, %v276_v32  ;;  %441 = vtanh.f32 %v252_v36  ;;  %vm283_vm1 = vweird.f32 %v438_v39  ;;  %vm265_vm4 = vmor %vm263_vm2, %vm264_vm0  ;;  %vm302_vm9 = vweird.f32 %v296_v37 }
  0xcb   :  { %v260_v42 = vsub.f32 1.0, %v259_v40  ;;  %vm284_vm5 = vmor %vm282_vm3, %vm283_vm1  ;;  %v306_v5 = vand.u32 2147483647, %v296_v37  ;;  %v309_v7 = vor.u32 1.1754944e-38, %v308_v4 }
  0xcc   :  { %v279_v43 = vsub.f32 1.0, %v278_v41 }
  0xcd   :  { %v261_v46 = vmul.f32 %v436_v38, %v260_v42  ;;  %vm307_vm11 = vcmp.eq.f32.partialorder %v306_v5, 8.507059e+37 }
  0xce   :  { %v280_v48 = vmul.f32 %v438_v39, %v279_v43 }
  0xcf   :  { %v440_v50 = vpop.eup %439  ;;  %v262_v51 = vadd.f32 %v436_v38, %v261_v46 }
  0xd0   :  { %v442_v52 = vpop.eup %441  ;;  %v298_v53 = vmul.f32 %v440_v50, %v296_v37  ;;  %v281_v55 = vadd.f32 %v438_v39, %v280_v48  ;;  %vm303_vm8 = vweird.f32 %v440_v50 }
  0xd1   :  { %v266_v58 = vsel %vm265_vm4, %v436_v38, %v262_v51  ;;  %vm304_vm10 = vmor %vm302_vm9, %vm303_vm8 }
  0xd2   :  { %v271_v59 = vsel %vm268_vm6, %v270_v54, %v266_v58  ;;  %v285_v60 = vsel %vm284_vm5, %v438_v39, %v281_v55  ;;  %v299_v61 = vsub.f32 1.0, %v298_v53 }
  0xd3   :  { %v290_v62 = vsel %vm287_vm7, %v289_v56, %v285_v60  ;;  %v313_v63 = vmul.f32 %v442_v52, %v271_v59 }
  0xd4   :  { %v312_v0 = vmul.f32 %v290_v62, %v101_v57  ;;  %v300_v1 = vmul.f32 %v440_v50, %v299_v61 }
  0xd6   :  { %v314_v2 = vadd.f32 %v313_v63, %v312_v0  ;;  %v301_v3 = vadd.f32 %v440_v50, %v300_v1 }
  0xd8   :  { %362 = vst [vmem:[#allocation14] sm:$0xff] %v314_v2  ;;  %443 = vtanh.f32 %v314_v2  ;;  %v305_v6 = vsel %vm304_vm10, %v440_v50, %v301_v3 }
  0xd9   :  { %v310_v9 = vsel %vm307_vm11, %v309_v7, %v305_v6 }
  0xde   :  { %v444_v8 = vpop.eup %443 }
  0xdf   :  { %v316_v10 = vmul.f32 %v444_v8, %v310_v9 }
  0xe1   :  { %353 = vmatmul.f32.vlgmr.msrb.gmra.mxu0 %v316_v10  ;;  %361 = vst [vmem:[#allocation12] sm:$0xff] %v316_v10 }
  0xe2   :  { %384 = dma.vmem_to_hbm [thread:$0]  %s380_s4, 128, %s382_s11, [#allocation13]  }
  0xe3   :  { %395 = dma.vmem_to_hbm [thread:$0]  %s391_s13, 128, %s393_s16, [#allocation13]  }
 0x15e   :  { %v354_v12 = vpop.f32.mrf.mxu0 }
 0x15f   :  { %v355_v13 = vadd.f32 %v428_v11, %v354_v12 }
 0x161   :  { %v357_v14 = vmul.f32 0.2, %v355_v13 }
 0x163   :  { %445 = vtanh.f32 %v357_v14 }
 0x169   :  { %v446_v15 = vpop.eup %445 }
 0x16a   :  { %v359_v16 = vmul.f32 2.5, %v446_v15 }
 0x16c   :  { %360 = vst [vmem:[#allocation11] sm:$0xff] %v359_v16 }
 0x16d   :  { %373 = dma.vmem_to_hbm [thread:$0]  %s369_s1, 128, %s371_s21, [#allocation4]  }
 0x16e   :  { %645 = dma.done.wait [#allocation4], 128  }
 0x16f   :  { %646 = vsyncadd [#allocation4], 4294967168 }
 0x170   :  { %647 = dma.done.wait [#allocation13], 256  }
 0x171   :  { %648 = vsyncadd [#allocation13], 4294967040 }
 0x172   :  { %408 = vsyncpa [#allocation3], 1 }
 0x173   :  { %409 = vsyncpa [#allocation6], 1 }
 0x174   :  { %410 = vsyncpa [#allocation9], 1 }
 0x175   :  { %411 = vsyncpa [#allocation4], 1 }
 0x176   :  { %412 = vsyncpa [#allocation13], 1 }

</bundles_post_ra>
